<compile_context>
chip_gen: v5e
topology: v5e:2x2
jax: 0.10.0
libtpu: 0.0.40
codegen_flags: <defaults>
</compile_context>

<pallas_src>
import functools

import jax
import jax.numpy as jnp
from jax import lax
from jax.experimental import pallas as pl
from jax.experimental.pallas import tpu as pltpu

ALPHA = 0.01      # LeakyReLU negative slope (module: alpha = 0.01)
EPS = 1e-5        # nn.InstanceNorm2d default eps
KH = 3            # conv kernel height (kernel width is 1)
RED_W = 128       # lane width of the MXU reduction matrix (tile-aligned)


def _leaky(v):
    return jnp.where(v > 0, v, ALPHA * v)


def conv_blk_kernel(x_ref, wbig_ref, p_ref, red_ref, o_ref, *, r1, r2, w):
    # x_ref : (r1, HW)  with r1 = block_n*C_in, rows ordered (sample-major, channel-minor)
    # wbig_ref: (r2, KH*r1) block-diagonal conv weight (r2 = block_n*C_out)
    # p_ref : (r1+r2, 2) packed [gamma, beta] rows for norm1 then norm2
    # red_ref: (HW, RED_W) ; col0 = 1/HW, col1 = (lane < H_out*W)/(H_out*W), rest 0
    # o_ref : (r2, HW)  full lane-dense output slab (trailing 2*W lanes are junk)
    x = x_ref[...].astype(jnp.float32)                       # (r1, HW)
    hw = x.shape[1]
    red = red_ref[...]                                       # (HW, RED_W)

    # ---- InstanceNorm1 + LeakyReLU: moments via one MXU matmul (col 0 of red).
    mom1 = jnp.dot(jnp.concatenate([x, x * x], axis=0), red,
                   preferred_element_type=jnp.float32)       # (2*r1, RED_W)
    mean1 = mom1[:r1, 0:1]
    # Single-pass variance (E[x^2]-mean^2), clamped >= 0.  TODO(synk): switch to a
    # two-pass/shifted-moment form if tighter tolerances are ever required.
    var1 = jnp.maximum(mom1[r1:, 0:1] - mean1 * mean1, 0.0)
    scale1 = p_ref[0:r1, 0:1] * lax.rsqrt(var1 + EPS)
    shift1 = p_ref[0:r1, 1:2] - mean1 * scale1
    y = _leaky(x * scale1 + shift1)                          # (r1, HW)

    # ---- Conv2d(C_in, C_out, (3,1), no bias), VALID.
    # Shifted slabs via XLU rolls (valid output rows never read wrapped lanes),
    # stacked along sublanes; one aligned MXU matmul against the block-diagonal
    # weight contracts over (kh, c_in, sample) at once.
    slabs = [y] + [pltpu.roll(y, hw - kh * w, axis=1) for kh in range(1, KH)]
    ystack = jnp.concatenate(slabs, axis=0)                  # (KH*r1, HW)
    z = jnp.dot(wbig_ref[...], ystack,
                preferred_element_type=jnp.float32)          # (r2, HW)

    # ---- InstanceNorm2 + LeakyReLU: masked moments (col 1 of red zeroes the
    # invalid trailing lanes, so the stats only see the H_out*W valid positions).
    mom2 = jnp.dot(jnp.concatenate([z, z * z], axis=0), red,
                   preferred_element_type=jnp.float32)       # (2*r2, RED_W)
    mean2 = mom2[:r2, 1:2]
    var2 = jnp.maximum(mom2[r2:, 1:2] - mean2 * mean2, 0.0)
    scale2 = p_ref[r1:r1 + r2, 0:1] * lax.rsqrt(var2 + EPS)
    shift2 = p_ref[r1:r1 + r2, 1:2] - mean2 * scale2
    o_ref[...] = _leaky(z * scale2 + shift2).astype(o_ref.dtype)  # dense 256-lane store


def _pick_block_n(n, c_in, c_out, hw, max_block=16, vmem_budget=20 * 1024 * 1024):
    """Pick samples-per-grid-step.

    Constraints / preferences:
      * block_n*C_in and block_n*C_out multiples of 8 (sublane-dense blocks),
        or block_n == N (full array dims are always legal).
      * stay under a conservative VMEM budget (block-diag weight grows ~ block_n^2).
      * prefer grid >= 4 (>= 2 pipelined steps per TensorCore on dual-TC chips),
        then grid >= 2, then the largest feasible block.
    """
    divs = [d for d in range(1, n + 1) if n % d == 0]
    feasible = [d for d in divs
                if ((d * c_in) % 8 == 0 and (d * c_out) % 8 == 0) or d == n]

    def vmem_est(d):
        f32 = 4
        io = 2 * (d * c_in * hw + d * c_out * hw) * f32          # double-buffered in/out
        wbig = 2 * (d * c_out) * (KH * d * c_in) * f32           # block-diagonal weight
        red = 2 * hw * RED_W * f32                               # reduction matrix
        live = (8 * d * c_in * hw + 5 * d * c_out * hw) * f32    # y/ystack/z/moments headroom
        return io + wbig + red + live

    cands = [d for d in feasible if d <= max_block and vmem_est(d) <= vmem_budget]
    if not cands:
        cands = [min(feasible)]
    for min_grid in (4, 2, 1):
        sel = [d for d in cands if n // d >= min_grid]
        if sel:
            return max(sel)
    return max(cands)


def conv_blk(x, weight, gamma1, beta1, gamma2, beta2, *, block_n=None):
    """x: (N, C_in, H, W); weight: PyTorch OIHW (C_out, C_in, 3, 1); norm params: (C,)."""
    N, C_in, H, W = x.shape
    C_out, c_in_w, kh, kw = weight.shape
    assert kh == KH and kw == 1 and c_in_w == C_in
    H_out = H - (KH - 1)
    HW = H * W
    HOW = H_out * W

    if block_n is None:
        block_n = _pick_block_n(N, C_in, C_out, HW)
    assert N % block_n == 0, (N, block_n)
    grid_n = N // block_n
    R1 = block_n * C_in
    R2 = block_n * C_out

    # Sublane/lane-dense view: rows = (sample, channel), lanes = flattened (H, W).
    x2 = x.reshape(N * C_in, HW)

    # Block-diagonal conv weight: W_big[n*C_out+o, k*(Nb*C_in)+m*C_in+i] = (n==m)*w[o,i,k].
    w3 = weight[:, :, :, 0].astype(jnp.float32)               # (C_out, C_in, KH)
    eye = jnp.eye(block_n, dtype=jnp.float32)
    w_big = jnp.einsum("nm,oik->nokmi", eye, w3).reshape(R2, KH * R1)

    # Packed affine params: rows [0, R1) -> norm1, rows [R1, R1+R2) -> norm2; cols [gamma, beta].
    p1 = jnp.stack([jnp.tile(gamma1.astype(jnp.float32), block_n),
                    jnp.tile(beta1.astype(jnp.float32), block_n)], axis=1)
    p2 = jnp.stack([jnp.tile(gamma2.astype(jnp.float32), block_n),
                    jnp.tile(beta2.astype(jnp.float32), block_n)], axis=1)
    params = jnp.concatenate([p1, p2], axis=0)                # (R1+R2, 2)

    # MXU reduction matrix: col 0 averages all HW lanes (norm1), col 1 averages
    # only the HOW valid lanes (norm2 mask), remaining columns are zero filler.
    lane = jnp.arange(HW, dtype=jnp.int32)[:, None]
    col = jnp.arange(RED_W, dtype=jnp.int32)[None, :]
    red = jnp.where(col == 0, 1.0 / HW,
                    jnp.where((col == 1) & (lane < HOW), 1.0 / HOW, 0.0)
                    ).astype(jnp.float32)

    out2 = pl.pallas_call(
        functools.partial(conv_blk_kernel, r1=R1, r2=R2, w=W),
        out_shape=jax.ShapeDtypeStruct((N * C_out, HW), x.dtype),
        grid_spec=pltpu.PrefetchScalarGridSpec(
            num_scalar_prefetch=0,
            grid=(grid_n,),
            in_specs=[
                pl.BlockSpec((R1, HW), lambda n: (n, 0)),            # activations
                pl.BlockSpec((R2, KH * R1), lambda n: (0, 0)),       # block-diag weight
                pl.BlockSpec((R1 + R2, 2), lambda n: (0, 0)),        # packed gamma/beta
                pl.BlockSpec((HW, RED_W), lambda n: (0, 0)),         # reduction matrix
            ],
            out_specs=pl.BlockSpec((R2, HW), lambda n: (n, 0)),
        ),
        compiler_params=pltpu.CompilerParams(
            dimension_semantics=("parallel",),
            vmem_limit_bytes=32 * 1024 * 1024,
        ),
    )(x2, w_big, params, red)

    # Drop the invalid trailing 2*W positions (written dense, sliced here).
    return out2.reshape(N, C_out, H, W)[:, :, :H_out, :]


def conv_blk_ref(x, weight, gamma1, beta1, gamma2, beta2):
    """Pure-JAX reference matching the PyTorch ConvBlk forward."""
    def inorm(v, g, b):
        m = v.mean(axis=(2, 3), keepdims=True)
        var = ((v - m) ** 2).mean(axis=(2, 3), keepdims=True)
        return (v - m) / jnp.sqrt(var + EPS) * g.reshape(1, -1, 1, 1) + b.reshape(1, -1, 1, 1)

    y = _leaky(inorm(x, gamma1, beta1))
    z = lax.conv_general_dilated(
        y, weight, window_strides=(1, 1), padding="VALID",
        dimension_numbers=("NCHW", "OIHW", "NCHW"))
    return _leaky(inorm(z, gamma2, beta2))


def _run_case(key, n, c_in, c_out, h, w):
    k1, k2, k3, k4, k5, k6 = jax.random.split(key, 6)
    x = jax.random.normal(k1, (n, c_in, h, w), jnp.float32)
    weight = 0.1 * jax.random.normal(k2, (c_out, c_in, KH, 1), jnp.float32)
    gamma1 = 1.0 + 0.1 * jax.random.normal(k3, (c_in,), jnp.float32)
    beta1 = 0.1 * jax.random.normal(k4, (c_in,), jnp.float32)
    gamma2 = 1.0 + 0.1 * jax.random.normal(k5, (c_out,), jnp.float32)
    beta2 = 0.1 * jax.random.normal(k6, (c_out,), jnp.float32)

    out = jax.block_until_ready(conv_blk(x, weight, gamma1, beta1, gamma2, beta2))
    assert out.shape == (n, c_out, h - (KH - 1), w), out.shape

    ref = conv_blk_ref(x, weight, gamma1, beta1, gamma2, beta2)
    max_err = float(jnp.max(jnp.abs(out - ref)))
    # Tolerance covers single-pass variance + MXU accumulation ordering; any
    # structural/indexing bug (roll direction, masking, weight layout) is O(0.1-1).
    assert jnp.allclose(out, ref, rtol=1e-2, atol=1e-2), f"max_err={max_err}"


if __name__ == "__main__":
    key = jax.random.PRNGKey(0)
    ka, kb, kc = jax.random.split(key, 3)
    _run_case(ka, n=2, c_in=4, c_out=8, h=16, w=16)    # block_n=2, grid=1
    _run_case(kb, n=16, c_in=4, c_out=8, h=16, w=16)   # block_n=4, grid=4 (multi-sample blocks)
    _run_case(kc, n=4, c_in=8, c_out=16, h=16, w=16)   # block_n=1, grid=4 (8-dense channels)
    print("KERNEL_OK")
</pallas_src>

<mosaic_0001>
module attributes {stable_mosaic.version = 11 : i64} {
  func.func @conv_blk_kernel(%arg0: i32, %arg1: memref<8x256xf32, #tpu.memory_space<vmem>>, %arg2: memref<16x24xf32, #tpu.memory_space<vmem>>, %arg3: memref<24x2xf32, #tpu.memory_space<vmem>>, %arg4: memref<256x128xf32, #tpu.memory_space<vmem>>, %arg5: memref<16x256xf32, #tpu.memory_space<vmem>>) attributes {dimension_semantics = [#tpu.dimension_semantics<parallel>], iteration_bounds = array<i64: 1>, scalar_prefetch = 0 : i64, scratch_operands = 0 : i64, tpu.core_type = #tpu.core_type<tc>, window_params = [{transform_indices = @transform_0, window_bounds = array<i64: 8, 256>}, {pipeline_mode = #tpu.pipeline_mode<synchronous>, transform_indices = @transform_1, window_bounds = array<i64: 16, 24>}, {pipeline_mode = #tpu.pipeline_mode<synchronous>, transform_indices = @transform_2, window_bounds = array<i64: 24, 2>}, {pipeline_mode = #tpu.pipeline_mode<synchronous>, transform_indices = @transform_3, window_bounds = array<i64: 256, 128>}, {transform_indices = @transform_4, window_bounds = array<i64: 16, 256>}]} {
    %c0 = arith.constant 0 : index
    %c0_0 = arith.constant 0 : index
    %0 = vector.load %arg1[%c0, %c0_0] : memref<8x256xf32, #tpu.memory_space<vmem>>, vector<8x256xf32>
    %c0_1 = arith.constant 0 : index
    %c0_2 = arith.constant 0 : index
    %1 = vector.load %arg4[%c0_1, %c0_2] : memref<256x128xf32, #tpu.memory_space<vmem>>, vector<256x128xf32>
    %2 = arith.mulf %0, %0 : vector<8x256xf32>
    %3 = tpu.concatenate %0, %2 in 0 : vector<8x256xf32>, vector<8x256xf32> -> vector<16x256xf32>
    %cst = arith.constant dense<0.000000e+00> : vector<16x128xf32>
    %4 = tpu.matmul %3, %1, %cst {dimension_numbers = #tpu.dot_dimension_numbers<[1], [0], [0], [1], [0, 0, 1, 1], [], []>} : vector<16x256xf32>, vector<256x128xf32>, vector<16x128xf32> -> vector<16x128xf32>
    %5 = vector.extract_strided_slice %4 {offsets = [0, 0], sizes = [8, 1], strides = [1, 1]} : vector<16x128xf32> to vector<8x1xf32>
    %6 = vector.extract_strided_slice %4 {offsets = [8, 0], sizes = [8, 1], strides = [1, 1]} : vector<16x128xf32> to vector<8x1xf32>
    %7 = arith.mulf %5, %5 : vector<8x1xf32>
    %8 = arith.subf %6, %7 : vector<8x1xf32>
    %cst_3 = arith.constant 0.000000e+00 : f32
    %9 = vector.broadcast %cst_3 : f32 to vector<8x1xf32>
    %10 = arith.maximumf %8, %9 : vector<8x1xf32>
    %c0_4 = arith.constant 0 : index
    %c0_5 = arith.constant 0 : index
    %11 = vector.load %arg3[%c0_4, %c0_5] : memref<24x2xf32, #tpu.memory_space<vmem>>, vector<8x1xf32>
    %cst_6 = arith.constant 9.99999974E-6 : f32
    %12 = vector.broadcast %cst_6 : f32 to vector<8x1xf32>
    %13 = arith.addf %10, %12 : vector<8x1xf32>
    %14 = math.rsqrt %13 : vector<8x1xf32>
    %15 = arith.mulf %11, %14 : vector<8x1xf32>
    %c0_7 = arith.constant 0 : index
    %c1 = arith.constant 1 : index
    %16 = vector.load %arg3[%c0_7, %c1] : memref<24x2xf32, #tpu.memory_space<vmem>>, vector<8x1xf32>
    %17 = arith.mulf %5, %15 : vector<8x1xf32>
    %18 = arith.subf %16, %17 : vector<8x1xf32>
    %19 = vector.broadcast %15 : vector<8x1xf32> to vector<8x256xf32>
    %20 = arith.mulf %0, %19 : vector<8x256xf32>
    %21 = vector.broadcast %18 : vector<8x1xf32> to vector<8x256xf32>
    %22 = arith.addf %20, %21 : vector<8x256xf32>
    %cst_8 = arith.constant 0.000000e+00 : f32
    %23 = vector.broadcast %cst_8 : f32 to vector<8x256xf32>
    %24 = arith.cmpf ogt, %22, %23 : vector<8x256xf32>
    %cst_9 = arith.constant 0.00999999977 : f32
    %25 = vector.broadcast %cst_9 : f32 to vector<8x256xf32>
    %26 = arith.mulf %25, %22 : vector<8x256xf32>
    %27 = arith.select %24, %22, %26 : vector<8x256xi1>, vector<8x256xf32>
    %c240_i32 = arith.constant 240 : i32
    %28 = tpu.dynamic_rotate %27 by %c240_i32 dim 1 : vector<8x256xf32>, i32 -> vector<8x256xf32>
    %c224_i32 = arith.constant 224 : i32
    %29 = tpu.dynamic_rotate %27 by %c224_i32 dim 1 : vector<8x256xf32>, i32 -> vector<8x256xf32>
    %30 = tpu.concatenate %27, %28, %29 in 0 : vector<8x256xf32>, vector<8x256xf32>, vector<8x256xf32> -> vector<24x256xf32>
    %c0_10 = arith.constant 0 : index
    %c0_11 = arith.constant 0 : index
    %31 = vector.load %arg2[%c0_10, %c0_11] : memref<16x24xf32, #tpu.memory_space<vmem>>, vector<16x24xf32>
    %cst_12 = arith.constant dense<0.000000e+00> : vector<16x256xf32>
    %32 = tpu.matmul %31, %30, %cst_12 {dimension_numbers = #tpu.dot_dimension_numbers<[1], [0], [0], [1], [0, 0, 1, 1], [], []>} : vector<16x24xf32>, vector<24x256xf32>, vector<16x256xf32> -> vector<16x256xf32>
    %33 = arith.mulf %32, %32 : vector<16x256xf32>
    %34 = tpu.concatenate %32, %33 in 0 : vector<16x256xf32>, vector<16x256xf32> -> vector<32x256xf32>
    %cst_13 = arith.constant dense<0.000000e+00> : vector<32x128xf32>
    %35 = tpu.matmul %34, %1, %cst_13 {dimension_numbers = #tpu.dot_dimension_numbers<[1], [0], [0], [1], [0, 0, 1, 1], [], []>} : vector<32x256xf32>, vector<256x128xf32>, vector<32x128xf32> -> vector<32x128xf32>
    %36 = vector.extract_strided_slice %35 {offsets = [0, 1], sizes = [16, 1], strides = [1, 1]} : vector<32x128xf32> to vector<16x1xf32>
    %37 = vector.extract_strided_slice %35 {offsets = [16, 1], sizes = [16, 1], strides = [1, 1]} : vector<32x128xf32> to vector<16x1xf32>
    %38 = arith.mulf %36, %36 : vector<16x1xf32>
    %39 = arith.subf %37, %38 : vector<16x1xf32>
    %cst_14 = arith.constant 0.000000e+00 : f32
    %40 = vector.broadcast %cst_14 : f32 to vector<16x1xf32>
    %41 = arith.maximumf %39, %40 : vector<16x1xf32>
    %c8 = arith.constant 8 : index
    %c0_15 = arith.constant 0 : index
    %42 = vector.load %arg3[%c8, %c0_15] : memref<24x2xf32, #tpu.memory_space<vmem>>, vector<16x1xf32>
    %cst_16 = arith.constant 9.99999974E-6 : f32
    %43 = vector.broadcast %cst_16 : f32 to vector<16x1xf32>
    %44 = arith.addf %41, %43 : vector<16x1xf32>
    %45 = math.rsqrt %44 : vector<16x1xf32>
    %46 = arith.mulf %42, %45 : vector<16x1xf32>
    %c8_17 = arith.constant 8 : index
    %c1_18 = arith.constant 1 : index
    %47 = vector.load %arg3[%c8_17, %c1_18] : memref<24x2xf32, #tpu.memory_space<vmem>>, vector<16x1xf32>
    %48 = arith.mulf %36, %46 : vector<16x1xf32>
    %49 = arith.subf %47, %48 : vector<16x1xf32>
    %50 = vector.broadcast %46 : vector<16x1xf32> to vector<16x256xf32>
    %51 = arith.mulf %32, %50 : vector<16x256xf32>
    %52 = vector.broadcast %49 : vector<16x1xf32> to vector<16x256xf32>
    %53 = arith.addf %51, %52 : vector<16x256xf32>
    %cst_19 = arith.constant 0.000000e+00 : f32
    %54 = vector.broadcast %cst_19 : f32 to vector<16x256xf32>
    %55 = arith.cmpf ogt, %53, %54 : vector<16x256xf32>
    %cst_20 = arith.constant 0.00999999977 : f32
    %56 = vector.broadcast %cst_20 : f32 to vector<16x256xf32>
    %57 = arith.mulf %56, %53 : vector<16x256xf32>
    %58 = arith.select %55, %53, %57 : vector<16x256xi1>, vector<16x256xf32>
    %c0_21 = arith.constant 0 : index
    %c0_22 = arith.constant 0 : index
    %59 = vector.load %arg5[%c0_21, %c0_22] : memref<16x256xf32, #tpu.memory_space<vmem>>, vector<16x256xf32>
    tpu.vector_store %arg5[%c0_21, %c0_22], %58 {strides = array<i32>} : memref<16x256xf32, #tpu.memory_space<vmem>>, vector<16x256xf32>,
    return
  }
  func.func @transform_0(%arg0: i32) -> (i32, i32) {
    %c0_i32 = arith.constant 0 : i32
    %c0_i32_0 = arith.constant 0 : i32
    return %arg0, %c0_i32 : i32, i32
  }
  func.func @transform_1(%arg0: i32) -> (i32, i32) {
    %c0_i32 = arith.constant 0 : i32
    %c0_i32_0 = arith.constant 0 : i32
    %c0_i32_1 = arith.constant 0 : i32
    return %c0_i32, %c0_i32_0 : i32, i32
  }
  func.func @transform_2(%arg0: i32) -> (i32, i32) {
    %c0_i32 = arith.constant 0 : i32
    %c0_i32_0 = arith.constant 0 : i32
    %c0_i32_1 = arith.constant 0 : i32
    return %c0_i32, %c0_i32_0 : i32, i32
  }
  func.func @transform_3(%arg0: i32) -> (i32, i32) {
    %c0_i32 = arith.constant 0 : i32
    %c0_i32_0 = arith.constant 0 : i32
    %c0_i32_1 = arith.constant 0 : i32
    return %c0_i32, %c0_i32_0 : i32, i32
  }
  func.func @transform_4(%arg0: i32) -> (i32, i32) {
    %c0_i32 = arith.constant 0 : i32
    %c0_i32_0 = arith.constant 0 : i32
    return %arg0, %c0_i32 : i32, i32
  }
}

</mosaic_0001>

<bundles_post_ra>
// kernel: tpu_custom_call.1
= control target key start
LH: loop header
LB: loop body
LE: loop exit
PB: predicated region body
PF: predicated region fallthrough
CT: control target
= control target key end

     0   :  { %9 = vsyncpa [#allocation3], 0  ;;  %s630_s0 = inlined_call_operand.vmem [shape: f32[8,256], index: 0, kind: input, shape index: {}]   ;;  %s631_s1 = inlined_call_operand.hbm [shape: f32[16,24], index: 1, kind: input, shape index: {}]   ;;  %s632_s2 = inlined_call_operand.vmem [shape: f32[24,2], index: 2, kind: input, shape index: {}]   ;;  %s633_s3 = inlined_call_operand.hbm [shape: f32[256,128], index: 3, kind: input, shape index: {}]   ;;  %s634_s4 = inlined_call_operand.hbm [shape: f32[16,256], index: 4, kind: output, shape index: {}]  }
   0x1   :  { %10 = vsyncpa [#allocation6], 0 }
   0x2   :  { %11 = vsyncpa [#allocation4], 0  ;;  %s18_s17 = sshll.u32 %s631_s1, 4  ;;  %s538_s18 = smov [#allocation2]   ;;  %s19_s17 = int_to_ptr.hbm [resolvable:$true] %s18_s17 }
   0x3   :  { %s20_s19 = sshll.u32 %s538_s18, 4  ;;  %s33_s22 = sshll.u32 %s633_s3, 4  ;;  %s21_s19 = int_to_ptr.vmem [resolvable:$true] %s20_s19  ;;  %s34_s22 = int_to_ptr.hbm [resolvable:$true] %s33_s22 }
   0x4   :  { %s539_s23 = smov 128   ;;  %s540_s24 = smov 8  }
   0x5   :  { %26 = dma.hbm_to_vmem [thread:$0]  %s19_s17, 256, %s21_s19, [#allocation3], %s539_s23, %s539_s23, %s540_s24  }
   0x6   :  { %s541_s25 = smov [#allocation5]  }
   0x7   :  { %s35_s26 = sshll.u32 %s541_s25, 4  ;;  %s36_s26 = int_to_ptr.vmem [resolvable:$true] %s35_s26 }
   0x8   :  { %41 = dma.hbm_to_vmem [thread:$0]  %s34_s22, 4096, %s36_s26, [#allocation6], %s539_s23, %s539_s23, %s540_s24  }
   0x9   :  { %532 = dma.done.wait [#allocation3], 256  }
   0xa   :  { %533 = vsyncadd [#allocation3], 4294967040 }
   0xb   :  { %534 = dma.done.wait [#allocation6], 4096  }
   0xc   :  { %535 = vsyncadd [#allocation6], 4294963200  ;;  %v67_v0 = vld [vmem:[#allocation5 + $0x78] sm:$0xff]  ;;  %v66_v2 = vld [vmem:[#allocation5 + $0x70] sm:$0xff]  ;;  %v542_v41 = vmov 0   ;;  %s543_s30 = smov 1  }
   0xd   :  { %v83_v1 = vld [vmem:[#allocation5 + $0xf8] sm:$0xff]  ;;  %86 = vmatpush.msra.mxu0 %v67_v0  ;;  %v82_v3 = vld [vmem:[#allocation5 + $0xf0] sm:$0xff]  ;;  %v65_v4 = vld [vmem:[#allocation5 + $0x68] sm:$0xff]  ;;  %249 = vmatpush.msra.mxu2 %v67_v0  ;;  %v544_v57 = vmov 1   ;;  %s545_s5 = smov 112   ;;  %s546_s6 = smov 96  }
   0xe   :  { %109 = vmatpush.msra.mxu1 %v83_v1  ;;  %v81_v5 = vld [vmem:[#allocation5 + $0xe8] sm:$0xff]  ;;  %278 = vmatpush.msra.mxu3 %v83_v1  ;;  %v64_v6 = vld [vmem:[#allocation5 + $0x60] sm:$0xff]  ;;  %v63_v8 = vld [vmem:[#allocation5 + $0x58] sm:$0xff]  ;;  %vm192_vm7 = vcmask 195584   ;;  %s547_s7 = smov 127   ;;  %s407_s15 = sshll.u32 %s634_s4, 4  ;;  %s408_s15 = int_to_ptr.hbm [resolvable:$true] %s407_s15 }
   0xf   :  { %87 = vmatpush.msra.mxu0 %v66_v2  ;;  %v80_v7 = vld [vmem:[#allocation5 + $0xe0] sm:$0xff]  ;;  %250 = vmatpush.msra.mxu2 %v66_v2  ;;  %v79_v9 = vld [vmem:[#allocation5 + $0xd8] sm:$0xff]  ;;  %v62_v10 = vld [vmem:[#allocation5 + $0x50] sm:$0xff]  ;;  %s549_s16 = smov 256   ;;  %s550_s17 = smov 16  }
  0x10   :  { %110 = vmatpush.msra.mxu1 %v82_v3  ;;  %279 = vmatpush.msra.mxu3 %v82_v3  ;;  %v78_v11 = vld [vmem:[#allocation5 + $0xd0] sm:$0xff]  ;;  %v61_v12 = vld [vmem:[#allocation5 + $0x48] sm:$0xff]  ;;  %v60_v14 = vld [vmem:[#allocation5 + $0x40] sm:$0xff] }
  0x11   :  { %88 = vmatpush.msra.mxu0 %v65_v4  ;;  %251 = vmatpush.msra.mxu2 %v65_v4  ;;  %v77_v13 = vld [vmem:[#allocation5 + $0xc8] sm:$0xff]  ;;  %v76_v15 = vld [vmem:[#allocation5 + $0xc0] sm:$0xff]  ;;  %v59_v16 = vld [vmem:[#allocation5 + $0x38] sm:$0xff] }
  0x12   :  { %111 = vmatpush.msra.mxu1 %v81_v5  ;;  %280 = vmatpush.msra.mxu3 %v81_v5  ;;  %v75_v17 = vld [vmem:[#allocation5 + $0xb8] sm:$0xff]  ;;  %v58_v18 = vld [vmem:[#allocation5 + $0x30] sm:$0xff]  ;;  %v57_v20 = vld [vmem:[#allocation5 + $0x28] sm:$0xff] }
  0x13   :  { %89 = vmatpush.msra.mxu0 %v64_v6  ;;  %252 = vmatpush.msra.mxu2 %v64_v6  ;;  %v74_v19 = vld [vmem:[#allocation5 + $0xb0] sm:$0xff]  ;;  %v73_v21 = vld [vmem:[#allocation5 + $0xa8] sm:$0xff]  ;;  %v56_v22 = vld [vmem:[#allocation5 + $0x20] sm:$0xff] }
  0x14   :  { %112 = vmatpush.msra.mxu1 %v80_v7  ;;  %281 = vmatpush.msra.mxu3 %v80_v7  ;;  %v72_v23 = vld [vmem:[#allocation5 + $0xa0] sm:$0xff]  ;;  %v55_v24 = vld [vmem:[#allocation5 + $0x18] sm:$0xff]  ;;  %v54_v26 = vld [vmem:[#allocation5 + $0x10] sm:$0xff]  ;;  %v178_v7 = vlaneseq }
  0x15   :  { %90 = vmatpush.msra.mxu0 %v63_v8  ;;  %253 = vmatpush.msra.mxu2 %v63_v8  ;;  %v71_v25 = vld [vmem:[#allocation5 + $0x98] sm:$0xff]  ;;  %v70_v27 = vld [vmem:[#allocation5 + $0x90] sm:$0xff]  ;;  %v53_v28 = vld [vmem:[#allocation5 + $0x8] sm:$0xff] }
  0x16   :  { %113 = vmatpush.msra.mxu1 %v79_v9  ;;  %282 = vmatpush.msra.mxu3 %v79_v9  ;;  %v69_v29 = vld [vmem:[#allocation5 + $0x88] sm:$0xff]  ;;  %v52_v30 = vld [vmem:[#allocation5] sm:$0xff]  ;;  %v50_v32 = vld [vmem:[%s630_s0] sm:$0xff]  ;;  %v179_v9 = vand.u32 127, %v178_v7 }
  0x17   :  { %91 = vmatpush.msra.mxu0 %v62_v10  ;;  %254 = vmatpush.msra.mxu2 %v62_v10  ;;  %v68_v31 = vld [vmem:[#allocation5 + $0x80] sm:$0xff]  ;;  %v51_v33 = vld [vmem:[%s630_s0 + $0x8] sm:$0xff]  ;;  %v84_v34 = vmul.f32 %v50_v32, %v50_v32  ;;  %v135_v52 = vld [vmem:[%s632_s2] sm:$0xff] }
  0x18   :  { %114 = vmatpush.msra.mxu1 %v78_v11  ;;  %283 = vmatpush.msra.mxu3 %v78_v11  ;;  %v85_v35 = vmul.f32 %v51_v33, %v51_v33  ;;  %vm187_vm5 = vcmp.lt.s32.totalorder %v179_v9, 96  ;;  %vm180_vm6 = vcmp.lt.s32.totalorder %v179_v9, 112 }
  0x19   :  { %92 = vmatpush.msra.mxu0 %v61_v12  ;;  %255 = vmatpush.msra.mxu2 %v61_v12 }
  0x1a   :  { %115 = vmatpush.msra.mxu1 %v77_v13  ;;  %284 = vmatpush.msra.mxu3 %v77_v13 }
  0x1b   :  { %93 = vmatpush.msra.mxu0 %v60_v14  ;;  %256 = vmatpush.msra.mxu2 %v60_v14 }
  0x1c   :  { %116 = vmatpush.msra.mxu1 %v76_v15  ;;  %285 = vmatpush.msra.mxu3 %v76_v15 }
  0x1d   :  { %94 = vmatpush.msra.mxu0 %v59_v16  ;;  %257 = vmatpush.msra.mxu2 %v59_v16 }
  0x1e   :  { %117 = vmatpush.msra.mxu1 %v75_v17  ;;  %286 = vmatpush.msra.mxu3 %v75_v17 }
  0x1f   :  { %95 = vmatpush.msra.mxu0 %v58_v18  ;;  %258 = vmatpush.msra.mxu2 %v58_v18 }
  0x20   :  { %118 = vmatpush.msra.mxu1 %v74_v19  ;;  %287 = vmatpush.msra.mxu3 %v74_v19  ;;  %v190_v19 = vld [vmem:[#allocation2] sm:$0xff] }
  0x21   :  { %96 = vmatpush.msra.mxu0 %v57_v20  ;;  %259 = vmatpush.msra.mxu2 %v57_v20  ;;  %v191_v20 = vld [vmem:[#allocation2 + $0x8] sm:$0xff] }
  0x22   :  { %119 = vmatpush.msra.mxu1 %v73_v21  ;;  %288 = vmatpush.msra.mxu3 %v73_v21 }
  0x23   :  { %97 = vmatpush.msra.mxu0 %v56_v22  ;;  %260 = vmatpush.msra.mxu2 %v56_v22 }
  0x24   :  { %120 = vmatpush.msra.mxu1 %v72_v23  ;;  %289 = vmatpush.msra.mxu3 %v72_v23 }
  0x25   :  { %98 = vmatpush.msra.mxu0 %v55_v24  ;;  %261 = vmatpush.msra.mxu2 %v55_v24 }
  0x26   :  { %121 = vmatpush.msra.mxu1 %v71_v25  ;;  %290 = vmatpush.msra.mxu3 %v71_v25 }
  0x27   :  { %99 = vmatpush.msra.mxu0 %v54_v26  ;;  %262 = vmatpush.msra.mxu2 %v54_v26 }
  0x28   :  { %122 = vmatpush.msra.mxu1 %v70_v27  ;;  %291 = vmatpush.msra.mxu3 %v70_v27 }
  0x29   :  { %100 = vmatpush.msra.mxu0 %v53_v28  ;;  %263 = vmatpush.msra.mxu2 %v53_v28 }
  0x2a   :  { %123 = vmatpush.msra.mxu1 %v69_v29  ;;  %292 = vmatpush.msra.mxu3 %v69_v29 }
  0x2b   :  { %101 = vmatpush.msra.mxu0 %v52_v30  ;;  %264 = vmatpush.msra.mxu2 %v52_v30 }
  0x2c   :  { %124 = vmatpush.msra.mxu1 %v68_v31  ;;  %102 = vmatmul.f32.vlgmr.msra.gmra.mxu0 %v50_v32 }
  0x2d   :  { %125 = vmatmul.f32.vlgmr.msra.gmra.mxu1 %v51_v33  ;;  %293 = vmatpush.msra.mxu3 %v68_v31 }
  0x2e   :  { %438 = vset.pattern.permute.xlu0 %v542_v41  ;;  %451 = vset.pattern.permute.xlu2 %v542_v41 }
  0x2f   :  { %439 = vset.pattern.permute.xlu1 %v544_v57 }
  0x34   :  { %105 = vmatmul.f32.gmra.mxu0 %v84_v34 }
  0x35   :  { %128 = vmatmul.f32.gmra.mxu1 %v85_v35 }
  0xa9   :  { %v103_v36 = vpop.f32.mrf.mxu0 }
  0xaa   :  { %v126_v37 = vpop.f32.mrf.mxu1 }
  0xab   :  { %v127_v38 = vadd.f32 %v126_v37, %v103_v36 }
  0xad   :  { %v132_v42 = vmul.f32 %v127_v38, %v127_v38 }
  0xb1   :  { %v106_v39 = vpop.f32.mrf.mxu0 }
  0xb2   :  { %v129_v40 = vpop.f32.mrf.mxu1 }
  0xb3   :  { %v130_v43 = vadd.f32 %v129_v40, %v106_v39 }
  0xb5   :  { %v133_v44 = vsub.f32 %v130_v43, %v132_v42 }
  0xb7   :  { %v134_v45 = vmax.f32 %v133_v44, 0.0 }
  0xb9   :  { %v136_v46 = vadd.f32 1e-05, %v134_v45 }
  0xbb   :  { %454 = vrsqrt.f32 %v136_v46  ;;  %vm143_vm1 = vweird.f32 %v136_v46 }
  0xc1   :  { %v455_v47 = vpop.eup %454 }
  0xc2   :  { %v138_v48 = vmul.f32 %v455_v47, %v136_v46  ;;  %vm144_vm0 = vweird.f32 %v455_v47 }
  0xc3   :  { %vm145_vm2 = vmor %vm143_vm1, %vm144_vm0 }
  0xc4   :  { %v139_v49 = vmul.f32 %v455_v47, %v138_v48 }
  0xc6   :  { %v140_v50 = vmul.f32 0.5, %v139_v49 }
  0xc8   :  { %v141_v51 = vsub.f32 1.5, %v140_v50 }
  0xca   :  { %v142_v53 = vmul.f32 %v455_v47, %v141_v51 }
  0xcc   :  { %v146_v54 = vsel %vm145_vm2, %v455_v47, %v142_v53 }
  0xcd   :  { %v147_v55 = vmul.f32 %v146_v54, %v135_v52 }
  0xcf   :  { %v148_v56 = vmul.f32 %v147_v55, %v127_v38 }
  0xd1   :  { %150 = vrot.lane.b32.xlu0 %v148_v56, %s543_s30 }
  0xd9   :  { %156 = vperm.xlu0 %438, %v147_v55  }
  0xe1   :  { %452 = vset.pattern.permute.xlu0 %v544_v57 }
 0x143   :  { %v151_v58 = vpop.permute.xlu0 %150 }
 0x144   :  { %v153_v59 = vsub.f32 %v135_v52, %v151_v58 }
 0x146   :  { %163 = vperm.xlu1 %439, %v153_v59  }
 0x14b   :  { %v157_v60 = vpop.permute.xlu0 %156 }
 0x14c   :  { %v159_v61 = vmul.f32 %v157_v60, %v50_v32  ;;  %v160_v62 = vmul.f32 %v157_v60, %v51_v33 }
 0x14e   :  { %450 = vset.pattern.permute.xlu1 %v542_v41 }
 0x1b8   :  { %v164_v63 = vpop.permute.xlu1 %163 }
 0x1b9   :  { %v166_v0 = vadd.f32 %v164_v63, %v159_v61  ;;  %v167_v1 = vadd.f32 %v164_v63, %v160_v62 }
 0x1bb   :  { %v170_v2 = vmul.f32 0.01, %v166_v0  ;;  %v171_v3 = vmul.f32 0.01, %v167_v1  ;;  %vm168_vm3 = vcmp.gt.f32.partialorder %v166_v0, 0.0  ;;  %vm169_vm4 = vcmp.gt.f32.partialorder %v167_v1, 0.0 }
 0x1bd   :  { %v172_v4 = vsel %vm168_vm3, %v166_v0, %v170_v2  ;;  %v173_v5 = vsel %vm169_vm4, %v167_v1, %v171_v3  ;;  %v313_v0 = vld [vmem:[%s632_s2 + $0x8] sm:$0xff]  ;;  %v314_v3 = vld [vmem:[%s632_s2 + $0x10] sm:$0xff]  ;;  %s548_s2 = smov [#allocation7]  }
 0x1be   :  { %v445_v6 = vpack.i.bf16 %v173_v5, %v172_v4  ;;  %s405_s12 = sshll.u32 %s548_s2, 4  ;;  %s406_s12 = int_to_ptr.vmem [resolvable:$true] %s405_s12 }
 0x1c0   :  { %446 = vrot.lane.b32.xlu2 %v445_v6, %s545_s5  ;;  %441 = vrot.lane.b32.xlu1 %v445_v6, %s546_s6 }
 0x21a   :  { %v447_v8 = vpop.permute.xlu2 %446 }
 0x21b   :  { %v449_v11 = vunpack.i.h.bf16 %v447_v8  ;;  %v448_v12 = vunpack.i.l.bf16 %v447_v8 }
 0x21d   :  { %v181_v17 = vsel %vm180_vm6, %v448_v12, %v449_v11  ;;  %v182_v18 = vsel %vm180_vm6, %v449_v11, %v448_v12 }
 0x232   :  { %v442_v10 = vpop.permute.xlu1 %441 }
 0x233   :  { %v444_v13 = vunpack.i.h.bf16 %v442_v10  ;;  %v443_v14 = vunpack.i.l.bf16 %v442_v10 }
 0x235   :  { %v188_v15 = vsel %vm187_vm5, %v443_v14, %v444_v13  ;;  %v189_v16 = vsel %vm187_vm5, %v444_v13, %v443_v14 }
 0x236   :  { %212 = vmatpush.msrb.mxu0 %v188_v15  ;;  %235 = vmatpush.msrb.mxu1 %v189_v16 }
 0x238   :  { %213 = vmatpush.msrb.mxu0 %v181_v17  ;;  %236 = vmatpush.msrb.mxu1 %v182_v18 }
 0x23a   :  { %214 = vmatpush.msrb.mxu0 %v172_v4  ;;  %237 = vmatpush.msrb.mxu1 %v173_v5 }
 0x23b   :  { %421 = vmatmul.msk.f32.vlgmr.msrb.gmra.mxu0 %vm192_vm7, %v190_v19  ;;  %423 = vmatmul.msk.f32.vlgmr.msrb.gmra.mxu1 %vm192_vm7, %v190_v19 }
 0x243   :  { %422 = vmatmul.msk.f32.gmra.mxu0 %vm192_vm7, %v191_v20  ;;  %424 = vmatmul.msk.f32.gmra.mxu1 %vm192_vm7, %v191_v20 }
 0x2b8   :  { %v594_v21 = vpop.f32.mrf.mxu0  ;;  %v596_v22 = vpop.f32.mrf.mxu1 }
 0x2b9   :  { %265 = vmatmul.f32.vlgmr.msra.gmra.mxu2 %v594_v21  ;;  %294 = vmatmul.f32.vlgmr.msra.gmra.mxu3 %v596_v22  ;;  %v245_v25 = vmul.f32 %v594_v21, %v594_v21  ;;  %v246_v26 = vmul.f32 %v596_v22, %v596_v22 }
 0x2c0   :  { %v600_v23 = vpop.f32.mrf.mxu0  ;;  %v602_v24 = vpop.f32.mrf.mxu1 }
 0x2c1   :  { %268 = vmatmul.f32.gmra.mxu2 %v600_v23  ;;  %297 = vmatmul.f32.gmra.mxu3 %v602_v24  ;;  %v247_v27 = vmul.f32 %v600_v23, %v600_v23  ;;  %v248_v28 = vmul.f32 %v602_v24, %v602_v24 }
 0x2c9   :  { %271 = vmatmul.f32.gmra.mxu2 %v245_v25  ;;  %300 = vmatmul.f32.gmra.mxu3 %v246_v26 }
 0x2d1   :  { %274 = vmatmul.f32.gmra.mxu2 %v247_v27  ;;  %303 = vmatmul.f32.gmra.mxu3 %v248_v28 }
 0x33c   :  { %v266_v29 = vpop.f32.mrf.mxu2  ;;  %v295_v30 = vpop.f32.mrf.mxu3 }
 0x33d   :  { %v296_v33 = vadd.f32 %v295_v30, %v266_v29 }
 0x33f   :  { %v307_v36 = vmul.f32 %v296_v33, %v296_v33 }
 0x344   :  { %v269_v31 = vpop.f32.mrf.mxu2  ;;  %v298_v32 = vpop.f32.mrf.mxu3 }
 0x345   :  { %v299_v39 = vadd.f32 %v298_v32, %v269_v31 }
 0x347   :  { %v308_v44 = vmul.f32 %v299_v39, %v299_v39 }
 0x34c   :  { %v272_v34 = vpop.f32.mrf.mxu2  ;;  %v301_v35 = vpop.f32.mrf.mxu3 }
 0x34d   :  { %v302_v37 = vadd.f32 %v301_v35, %v272_v34 }
 0x34f   :  { %v309_v38 = vsub.f32 %v302_v37, %v307_v36 }
 0x351   :  { %v311_v40 = vmax.f32 %v309_v38, 0.0 }
 0x353   :  { %v315_v41 = vadd.f32 1e-05, %v311_v40 }
 0x354   :  { %v275_v42 = vpop.f32.mrf.mxu2  ;;  %v304_v43 = vpop.f32.mrf.mxu3 }
 0x355   :  { %456 = vrsqrt.f32 %v315_v41  ;;  %v305_v45 = vadd.f32 %v304_v43, %v275_v42  ;;  %vm323_vm9 = vweird.f32 %v315_v41 }
 0x357   :  { %v310_v46 = vsub.f32 %v305_v45, %v308_v44 }
 0x359   :  { %v312_v47 = vmax.f32 %v310_v46, 0.0 }
 0x35b   :  { %v457_v48 = vpop.eup %456  ;;  %v316_v49 = vadd.f32 1e-05, %v312_v47 }
 0x35c   :  { %v318_v50 = vmul.f32 %v457_v48, %v315_v41  ;;  %vm324_vm8 = vweird.f32 %v457_v48 }
 0x35d   :  { %458 = vrsqrt.f32 %v316_v49  ;;  %vm325_vm10 = vmor %vm323_vm9, %vm324_vm8  ;;  %vm333_vm12 = vweird.f32 %v316_v49 }
 0x35e   :  { %v319_v51 = vmul.f32 %v457_v48, %v318_v50 }
 0x360   :  { %v320_v52 = vmul.f32 0.5, %v319_v51 }
 0x362   :  { %v321_v53 = vsub.f32 1.5, %v320_v52 }
 0x363   :  { %v459_v54 = vpop.eup %458 }
 0x364   :  { %v328_v55 = vmul.f32 %v459_v54, %v316_v49  ;;  %v322_v56 = vmul.f32 %v457_v48, %v321_v53  ;;  %vm334_vm11 = vweird.f32 %v459_v54 }
 0x365   :  { %vm335_vm13 = vmor %vm333_vm12, %vm334_vm11 }
 0x366   :  { %v326_v58 = vsel %vm325_vm10, %v457_v48, %v322_v56  ;;  %v329_v59 = vmul.f32 %v459_v54, %v328_v55 }
 0x367   :  { %339 = vrot.lane.b32.xlu2 %v326_v58, %s547_s7 }
 0x368   :  { %v330_v60 = vmul.f32 0.5, %v329_v59 }
 0x36a   :  { %v331_v61 = vsub.f32 1.5, %v330_v60 }
 0x36c   :  { %v332_v62 = vmul.f32 %v459_v54, %v331_v61 }
 0x36e   :  { %v336_v63 = vsel %vm335_vm13, %v459_v54, %v332_v62 }
 0x36f   :  { %341 = vrot.lane.b32.xlu1 %v336_v63, %s547_s7 }
 0x3c1   :  { %v340_v1 = vpop.permute.xlu2 %339 }
 0x3c2   :  { %v345_v2 = vmul.f32 %v340_v1, %v313_v0 }
 0x3c4   :  { %349 = vrot.lane.b32.xlu2 %v345_v2, %s543_s30  ;;  %360 = vperm.xlu1 %450, %v345_v2  }
 0x3cc   :  { %453 = vset.pattern.permute.xlu1 %v544_v57 }
 0x3e1   :  { %v342_v4 = vpop.permute.xlu1 %341 }
 0x3e2   :  { %v346_v5 = vmul.f32 %v342_v4, %v314_v3 }
 0x3e4   :  { %364 = vperm.xlu2 %451, %v346_v5   ;;  %351 = vrot.lane.b32.xlu0 %v346_v5, %s543_s30 }
 0x41e   :  { %v350_v6 = vpop.permute.xlu2 %349 }
 0x41f   :  { %v355_v7 = vmul.f32 %v350_v6, %v296_v33 }
 0x421   :  { %v357_v8 = vsub.f32 %v313_v0, %v355_v7 }
 0x423   :  { %373 = vperm.xlu0 %452, %v357_v8  }
 0x436   :  { %v361_v12 = vpop.permute.xlu1 %360 }
 0x437   :  { %v367_v57 = vmul.f32 %v361_v12, %v594_v21  ;;  %v368_v13 = vmul.f32 %v361_v12, %v596_v22 }
 0x43e   :  { %v365_v25 = vpop.permute.xlu2 %364 }
 0x43f   :  { %v369_v26 = vmul.f32 %v365_v25, %v600_v23  ;;  %v370_v27 = vmul.f32 %v365_v25, %v602_v24 }
 0x456   :  { %v352_v9 = vpop.permute.xlu0 %351 }
 0x457   :  { %v356_v10 = vmul.f32 %v352_v9, %v299_v39 }
 0x459   :  { %v358_v11 = vsub.f32 %v314_v3, %v356_v10 }
 0x45b   :  { %378 = vperm.xlu1 %453, %v358_v11  }
 0x495   :  { %v374_v14 = vpop.permute.xlu0 %373 }
 0x496   :  { %v381_v15 = vadd.f32 %v374_v14, %v367_v57  ;;  %v382_v16 = vadd.f32 %v374_v14, %v368_v13 }
 0x498   :  { %vm385_vm14 = vcmp.gt.f32.partialorder %v381_v15, 0.0  ;;  %vm386_vm15 = vcmp.gt.f32.partialorder %v382_v16, 0.0  ;;  %v389_v17 = vmul.f32 0.01, %v381_v15  ;;  %v390_v18 = vmul.f32 0.01, %v382_v16 }
 0x49a   :  { %v393_v19 = vsel %vm385_vm14, %v381_v15, %v389_v17  ;;  %v394_v20 = vsel %vm386_vm15, %v382_v16, %v390_v18 }
 0x49b   :  { %397 = vst [vmem:[#allocation7] sm:$0xff] %v393_v19 }
 0x49c   :  { %398 = vst [vmem:[#allocation7 + $0x8] sm:$0xff] %v394_v20 }
 0x4cd   :  { %v379_v28 = vpop.permute.xlu1 %378 }
 0x4ce   :  { %v383_v21 = vadd.f32 %v379_v28, %v369_v26  ;;  %v384_v29 = vadd.f32 %v379_v28, %v370_v27 }
 0x4d0   :  { %vm387_vm0 = vcmp.gt.f32.partialorder %v383_v21, 0.0  ;;  %vm388_vm1 = vcmp.gt.f32.partialorder %v384_v29, 0.0  ;;  %v391_v22 = vmul.f32 0.01, %v383_v21  ;;  %v392_v30 = vmul.f32 0.01, %v384_v29 }
 0x4d2   :  { %v395_v31 = vsel %vm387_vm0, %v383_v21, %v391_v22  ;;  %v396_v32 = vsel %vm388_vm1, %v384_v29, %v392_v30 }
 0x4d3   :  { %399 = vst [vmem:[#allocation7 + $0x10] sm:$0xff] %v395_v31 }
 0x4d4   :  { %400 = vst [vmem:[#allocation7 + $0x18] sm:$0xff] %v396_v32 }
 0x4d5   :  { %413 = dma.vmem_to_hbm [thread:$0]  %s406_s12, 512, %s408_s15, [#allocation4], %s549_s16, %s549_s16, %s550_s17  }
 0x4d6   :  { %536 = dma.done.wait [#allocation4], 512  }
 0x4d7   :  { %537 = vsyncadd [#allocation4], 4294966784 }
 0x4d8   :  { %418 = vsyncpa [#allocation3], 1 }
 0x4d9   :  { %419 = vsyncpa [#allocation6], 1 }
 0x4da   :  { %420 = vsyncpa [#allocation4], 1 }

</bundles_post_ra>
